<compile_context>
chip_gen: v7x
topology: tpu7x:2x2x1
jax: 0.10.0
libtpu: 0.0.40
codegen_flags: <defaults>
</compile_context>

<pallas_src>
import functools

import jax
import jax.numpy as jnp
from jax.experimental import pallas as pl
from jax.experimental.pallas import tpu as pltpu


def _round_up(x, m):
    return ((x + m - 1) // m) * m


def _conv_pool_fc(emb2d, w_ref, mask_ref, b_ref, fcw_ref, fcb_ref, out_ref, *,
                  tb, s_len, k_max, filt_block):
    """Shared conv -> max-pool-over-time -> fused-FC core. emb2d: (TB*S, E_pad) bf16."""
    # One lane-dense bf16 MXU matmul covering every tap block of every filter width.
    y = jnp.dot(emb2d, w_ref[...], preferred_element_type=jnp.float32)
    y3 = y.reshape(tb, s_len, k_max * filt_block)            # (TB, S, k_max*FB) f32

    # Conv1d == sum over taps s of y3[:, t+s, block_s]; shift with pltpu.roll
    # (XLU, free slot) instead of sublane-unaligned time slices.  Wrapped
    # (invalid) tail rows are killed by the per-lane time mask below.
    conv = y3[:, :, 0:filt_block]
    for s in range(1, k_max):
        blk = y3[:, :, s * filt_block:(s + 1) * filt_block]
        conv = conv + pltpu.roll(blk, shift=s_len - s, axis=1)

    # mask[0, t, lane] = 0 where t is a valid conv position for that lane's
    # filter width, -1e30 otherwise; pad lanes are always "valid" so they stay 0.
    conv = conv + mask_ref[...]
    # Bias is constant over time -> add it after the max-pool.
    pooled = jnp.max(conv, axis=1) + b_ref[...]              # (TB, FB) f32

    # All per-task Linear layers fused into one padded bf16 matmul; the output
    # store is lane-dense (l_pad multiple of 128) and unmasked.
    out_ref[...] = (jnp.dot(pooled.astype(jnp.bfloat16), fcw_ref[...],
                            preferred_element_type=jnp.float32)
                    + fcb_ref[...])


def _cnn_gather_kernel(ids_ref, table_ref, w_ref, mask_ref, b_ref, fcw_ref,
                       fcb_ref, out_ref, *, v_pad, k_max, filt_block):
    """Fused path: in-kernel embedding gather (one-hot matmul) + conv/pool/FC."""
    tb, s_len = ids_ref.shape
    ids = ids_ref[...]                                        # (TB, S) int32
    iota_v = jax.lax.broadcasted_iota(jnp.int32, (tb, s_len, v_pad), 2)
    onehot = jnp.where(ids[:, :, None] == iota_v, 1.0, 0.0).astype(jnp.bfloat16)
    emb2d = jnp.dot(onehot.reshape(tb * s_len, v_pad), table_ref[...],
                    preferred_element_type=jnp.float32).astype(jnp.bfloat16)
    _conv_pool_fc(emb2d, w_ref, mask_ref, b_ref, fcw_ref, fcb_ref, out_ref,
                  tb=tb, s_len=s_len, k_max=k_max, filt_block=filt_block)


def _cnn_emb_kernel(emb_ref, w_ref, mask_ref, b_ref, fcw_ref, fcb_ref, out_ref,
                    *, k_max, filt_block):
    """Fallback path (large vocab): pre-gathered bf16 embeddings stream in."""
    tb, s_len, e_pad = emb_ref.shape
    emb2d = emb_ref[...].reshape(tb * s_len, e_pad)
    _conv_pool_fc(emb2d, w_ref, mask_ref, b_ref, fcw_ref, fcb_ref, out_ref,
                  tb=tb, s_len=s_len, k_max=k_max, filt_block=filt_block)


class CnnSentenceClassifierPallas:
    def __init__(self, vocab_size, embed_dims=100, num_labels_list=(2,),
                 num_filters=25, dropout=0.2, filters=(1, 2, 3),
                 batch_tile=128, key=jax.random.PRNGKey(0)):
        self.vocab_size = vocab_size
        self.embed_dims = embed_dims
        self.num_labels_list = tuple(num_labels_list)
        self.num_filters = num_filters
        self.filters = tuple(filters)
        self.dropout = dropout       # stored but (like the reference forward) unused
        self.batch_tile = max(8, _round_up(batch_tile, 8))

        F = num_filters
        nf = len(self.filters)
        self.k_max = max(self.filters)
        self.e_pad = _round_up(embed_dims, 128)              # lane-dense emb rows
        self.v_pad = _round_up(vocab_size, 128)
        self.filt_block = _round_up(nf * F, 128)             # all filters share one block
        self.total_labels = int(sum(self.num_labels_list))
        self.l_pad = _round_up(self.total_labels, 128)       # lane-dense output

        # In-kernel one-hot gather only pays off for modest vocabularies.
        # TODO(synk): for large vocabs, keep the table in HBM (memory_space=pl.ANY)
        # and DMA-gather rows per tile instead of the XLA-side jnp.take fallback.
        self.fuse_gather = self.v_pad <= 1024

        n_keys = 1 + 2 * nf + 2 * len(self.num_labels_list)
        keys = iter(jax.random.split(key, n_keys))

        # Embedding table: (V_pad, E_pad) bf16, zero-padded rows/cols.
        emb = jax.random.normal(next(keys), (vocab_size, embed_dims), jnp.float32) * 0.1
        table = jnp.zeros((self.v_pad, self.e_pad), jnp.float32)
        table = table.at[:vocab_size, :embed_dims].set(emb)
        self.embed = table.astype(jnp.bfloat16)

        # Conv1d params.  Tap block s (128-lane aligned) holds, at lanes
        # [i*F:(i+1)*F], tap s of filter i (zero columns if s >= filter width).
        w_fused = jnp.zeros((self.e_pad, self.k_max * self.filt_block), jnp.float32)
        b_row = jnp.zeros((1, self.filt_block), jnp.float32)
        lane_width = [1] * self.filt_block     # pad lanes: width 1 -> never masked
        for i, k in enumerate(self.filters):
            w = jax.random.normal(next(keys), (F, embed_dims, k), jnp.float32) * 0.05
            b = jax.random.normal(next(keys), (F,), jnp.float32) * 0.05
            for s in range(k):
                col0 = s * self.filt_block + i * F
                w_fused = w_fused.at[:embed_dims, col0:col0 + F].set(w[:, :, s].T)
            b_row = b_row.at[0, i * F:(i + 1) * F].set(b)
            for f in range(F):
                lane_width[i * F + f] = k
        self.w_fused = w_fused.astype(jnp.bfloat16)
        self.b_row = b_row
        self._lane_width = jnp.array(lane_width, jnp.int32)
        self._mask_cache = {}

        # Per-task Linear layers fused into one padded bf16 (FB, l_pad) matmul.
        fcw = jnp.zeros((self.filt_block, self.l_pad), jnp.float32)
        fcb = jnp.zeros((1, self.l_pad), jnp.float32)
        in_dim = F * nf
        off = 0
        for n_labels in self.num_labels_list:
            w = jax.random.normal(next(keys), (n_labels, in_dim), jnp.float32) * 0.05
            b = jax.random.normal(next(keys), (n_labels,), jnp.float32) * 0.05
            fcw = fcw.at[:in_dim, off:off + n_labels].set(w.T)
            fcb = fcb.at[0, off:off + n_labels].set(b)
            off += n_labels
        self.fcw = fcw.astype(jnp.bfloat16)
        self.fcb = fcb

    # --------------------------------------------------------------------- #
    @staticmethod
    def _full_spec(arr):
        nd = arr.ndim
        return pl.BlockSpec(arr.shape, lambda b, _nd=nd: (0,) * _nd)

    def _time_mask(self, s_len):
        mask = self._mask_cache.get(s_len)
        if mask is None:
            t = jnp.arange(s_len, dtype=jnp.int32)[:, None]          # (S, 1)
            valid = t <= (s_len - self._lane_width)[None, :]         # (S, FB)
            mask = jnp.where(valid, 0.0, -1e30).astype(jnp.float32)[None]  # (1,S,FB)
            self._mask_cache[s_len] = mask
        return mask

    def _pick_tile(self, batch):
        tb = max(8, min(self.batch_tile, _round_up(batch, 8)))
        # v7x has 2 TensorCores: make sure the "parallel" grid axis has >= 2
        # steps when the batch allows it, otherwise half the chip idles.
        if _round_up(batch, tb) // tb < 2 and tb >= 16:
            half = _round_up((tb + 1) // 2, 8)
            if _round_up(batch, half) // half >= 2:
                tb = half
        return tb

    def _vmem_limit(self, tb, s_len):
        # Rough per-step VMEM footprint: y3 + shifted conv (f32), gather one-hot
        # + emb2d, resident bf16 weights, double-buffered in/out tiles.
        fb = self.filt_block
        est = tb * s_len * (self.k_max + 2) * fb * 4
        est += tb * s_len * (self.v_pad * 2 + self.e_pad * 6)
        est += 2 * (self.embed.size + self.w_fused.size + self.fcw.size)
        est += 2 * (tb * s_len * 4 + tb * self.l_pad * 4)
        if est <= 24 << 20:
            return None          # default scoped VMEM is plenty on v5e/v6e/v7x
        # Stay safely under v7x's 64 MiB physical VMEM (v5e/v6e have 128 MiB).
        return int(min(_round_up(est + (est >> 1), 1 << 20), 48 << 20))

    # --------------------------------------------------------------------- #
    def _run_fused(self, ids, mask, tb):
        b_pad, s_len = ids.shape
        kernel = functools.partial(_cnn_gather_kernel, v_pad=self.v_pad,
                                   k_max=self.k_max, filt_block=self.filt_block)
        return pl.pallas_call(
            kernel,
            out_shape=jax.ShapeDtypeStruct((b_pad, self.l_pad), jnp.float32),
            grid=(b_pad // tb,),
            in_specs=[pl.BlockSpec((tb, s_len), lambda b: (b, 0)),
                      self._full_spec(self.embed),
                      self._full_spec(self.w_fused),
                      self._full_spec(mask),
                      self._full_spec(self.b_row),
                      self._full_spec(self.fcw),
                      self._full_spec(self.fcb)],
            out_specs=pl.BlockSpec((tb, self.l_pad), lambda b: (b, 0)),
            compiler_params=pltpu.CompilerParams(
                dimension_semantics=("parallel",),
                vmem_limit_bytes=self._vmem_limit(tb, s_len)),
        )(ids, self.embed, self.w_fused, mask, self.b_row, self.fcw, self.fcb)

    def _run_emb(self, emb, mask, tb):
        b_pad, s_len, e_pad = emb.shape
        kernel = functools.partial(_cnn_emb_kernel, k_max=self.k_max,
                                   filt_block=self.filt_block)
        return pl.pallas_call(
            kernel,
            out_shape=jax.ShapeDtypeStruct((b_pad, self.l_pad), jnp.float32),
            grid=(b_pad // tb,),
            in_specs=[pl.BlockSpec((tb, s_len, e_pad), lambda b: (b, 0, 0)),
                      self._full_spec(self.w_fused),
                      self._full_spec(mask),
                      self._full_spec(self.b_row),
                      self._full_spec(self.fcw),
                      self._full_spec(self.fcb)],
            out_specs=pl.BlockSpec((tb, self.l_pad), lambda b: (b, 0)),
            compiler_params=pltpu.CompilerParams(
                dimension_semantics=("parallel",),
                vmem_limit_bytes=self._vmem_limit(tb, s_len)),
        )(emb, self.w_fused, mask, self.b_row, self.fcw, self.fcb)

    # --------------------------------------------------------------------- #
    def forward(self, input_ids, labels=None):
        input_ids = jnp.asarray(input_ids, jnp.int32)
        batch, s_len = input_ids.shape
        if s_len < self.k_max:
            raise ValueError("sequence length must be >= max filter width")
        tb = self._pick_tile(batch)
        b_pad = _round_up(batch, tb)
        if b_pad != batch:
            input_ids = jnp.pad(input_ids, ((0, b_pad - batch), (0, 0)))
        mask = self._time_mask(s_len)

        if self.fuse_gather:
            logits_all = self._run_fused(input_ids, mask, tb)
        else:
            # TODO(synk): the large-vocab path still round-trips the (B, S, E)
            # tensor through HBM; replace with an in-kernel DMA gather.
            emb = jnp.take(self.embed, input_ids, axis=0)   # (B_pad, S, E_pad) bf16
            logits_all = self._run_emb(emb, mask, tb)

        logits_all = logits_all[:batch, :self.total_labels]

        logits = []
        loss = jnp.float32(0.0)
        off = 0
        for task_ind, n_labels in enumerate(self.num_labels_list):
            task_logits = logits_all[:, off:off + n_labels]
            off += n_labels
            logits.append(task_logits)
            if labels is not None:
                if labels.ndim == 2:
                    task_labels = labels[:, 0]
                elif labels.ndim == 3:
                    task_labels = labels[:, 0, task_ind]
                else:
                    raise ValueError("labels must be 2-D or 3-D")
                task_labels = task_labels.astype(jnp.int32)
                # nn.CrossEntropyLoss (mean reduction) in plain JAX glue.
                logp = jax.nn.log_softmax(task_logits, axis=-1)
                nll = -jnp.take_along_axis(logp, task_labels[:, None], axis=1)[:, 0]
                loss = loss + jnp.mean(nll)
        return loss, logits


if __name__ == "__main__":
    key = jax.random.PRNGKey(0)
    k_model, k_ids, k_labels = jax.random.split(key, 3)

    vocab_size = 50
    batch, seq = 2, 8
    model = CnnSentenceClassifierPallas(
        vocab_size=vocab_size, embed_dims=32, num_labels_list=(2,),
        num_filters=8, filters=(1, 2, 3), key=k_model)

    input_ids = jax.random.randint(k_ids, (batch, seq), 0, vocab_size, dtype=jnp.int32)
    labels = jax.random.randint(k_labels, (batch, 1), 0, 2, dtype=jnp.int32)

    loss, logits = model.forward(input_ids, labels=labels)
    jax.block_until_ready(loss)
    for l in logits:
        jax.block_until_ready(l)

    assert logits[0].shape == (batch, 2)
    assert bool(jnp.isfinite(loss))
    print("KERNEL_OK")
</pallas_src>

<mosaic_0001>
module attributes {stable_mosaic.version = 11 : i64} {
  func.func @_cnn_gather_kernel(%arg0: i32, %arg1: memref<8x8xi32, #tpu.memory_space<vmem>>, %arg2: memref<128x128xbf16, #tpu.memory_space<vmem>>, %arg3: memref<128x384xbf16, #tpu.memory_space<vmem>>, %arg4: memref<1x8x128xf32, #tpu.memory_space<vmem>>, %arg5: memref<1x128xf32, #tpu.memory_space<vmem>>, %arg6: memref<128x128xbf16, #tpu.memory_space<vmem>>, %arg7: memref<1x128xf32, #tpu.memory_space<vmem>>, %arg8: memref<8x128xf32, #tpu.memory_space<vmem>>) attributes {dimension_semantics = [#tpu.dimension_semantics<parallel>], iteration_bounds = array<i64: 1>, scalar_prefetch = 0 : i64, scratch_operands = 0 : i64, tpu.core_type = #tpu.core_type<tc>, window_params = [{transform_indices = @transform_0, window_bounds = array<i64: 8, 8>}, {pipeline_mode = #tpu.pipeline_mode<synchronous>, transform_indices = @transform_1, window_bounds = array<i64: 128, 128>}, {pipeline_mode = #tpu.pipeline_mode<synchronous>, transform_indices = @transform_2, window_bounds = array<i64: 128, 384>}, {pipeline_mode = #tpu.pipeline_mode<synchronous>, transform_indices = @transform_3, window_bounds = array<i64: 1, 8, 128>}, {pipeline_mode = #tpu.pipeline_mode<synchronous>, transform_indices = @transform_4, window_bounds = array<i64: 1, 128>}, {pipeline_mode = #tpu.pipeline_mode<synchronous>, transform_indices = @transform_5, window_bounds = array<i64: 128, 128>}, {pipeline_mode = #tpu.pipeline_mode<synchronous>, transform_indices = @transform_6, window_bounds = array<i64: 1, 128>}, {transform_indices = @transform_7, window_bounds = array<i64: 8, 128>}]} {
    %c0 = arith.constant 0 : index
    %c0_0 = arith.constant 0 : index
    %0 = vector.load %arg1[%c0, %c0_0] : memref<8x8xi32, #tpu.memory_space<vmem>>, vector<8x8xi32>
    %1 = tpu.iota {dimensions = array<i32: 2>} : vector<8x8x128xi32>
    %2 = vector.shape_cast %0 : vector<8x8xi32> to vector<8x8x1xi32>
    %3 = vector.broadcast %2 : vector<8x8x1xi32> to vector<8x8x128xi32>
    %4 = arith.cmpi eq, %3, %1 : vector<8x8x128xi32>
    %cst = arith.constant 1.000000e+00 : f32
    %cst_1 = arith.constant 0.000000e+00 : f32
    %5 = vector.broadcast %cst : f32 to vector<8x8x128xf32>
    %6 = vector.broadcast %cst_1 : f32 to vector<8x8x128xf32>
    %7 = arith.select %4, %5, %6 : vector<8x8x128xi1>, vector<8x8x128xf32>
    %8 = arith.truncf %7 : vector<8x8x128xf32> to vector<8x8x128xbf16>
    %9 = vector.shape_cast %8 : vector<8x8x128xbf16> to vector<64x128xbf16>
    %c0_2 = arith.constant 0 : index
    %c0_3 = arith.constant 0 : index
    %10 = vector.load %arg2[%c0_2, %c0_3] : memref<128x128xbf16, #tpu.memory_space<vmem>>, vector<128x128xbf16>
    %cst_4 = arith.constant dense<0.000000e+00> : vector<64x128xf32>
    %11 = tpu.matmul %9, %10, %cst_4 {dimension_numbers = #tpu.dot_dimension_numbers<[1], [0], [0], [1], [0, 0, 1, 1], [], []>} : vector<64x128xbf16>, vector<128x128xbf16>, vector<64x128xf32> -> vector<64x128xf32>
    %12 = arith.truncf %11 : vector<64x128xf32> to vector<64x128xbf16>
    %c0_5 = arith.constant 0 : index
    %c0_6 = arith.constant 0 : index
    %13 = vector.load %arg3[%c0_5, %c0_6] : memref<128x384xbf16, #tpu.memory_space<vmem>>, vector<128x384xbf16>
    %cst_7 = arith.constant dense<0.000000e+00> : vector<64x384xf32>
    %14 = tpu.matmul %12, %13, %cst_7 {dimension_numbers = #tpu.dot_dimension_numbers<[1], [0], [0], [1], [0, 0, 1, 1], [], []>} : vector<64x128xbf16>, vector<128x384xbf16>, vector<64x384xf32> -> vector<64x384xf32>
    %15 = vector.shape_cast %14 : vector<64x384xf32> to vector<8x8x384xf32>
    %16 = vector.extract_strided_slice %15 {offsets = [0, 0, 0], sizes = [8, 8, 128], strides = [1, 1, 1]} : vector<8x8x384xf32> to vector<8x8x128xf32>
    %17 = vector.extract_strided_slice %15 {offsets = [0, 0, 128], sizes = [8, 8, 128], strides = [1, 1, 1]} : vector<8x8x384xf32> to vector<8x8x128xf32>
    %c7_i32 = arith.constant 7 : i32
    %18 = tpu.dynamic_rotate %17 by %c7_i32 dim 1 : vector<8x8x128xf32>, i32 -> vector<8x8x128xf32>
    %19 = arith.addf %16, %18 : vector<8x8x128xf32>
    %20 = vector.extract_strided_slice %15 {offsets = [0, 0, 256], sizes = [8, 8, 128], strides = [1, 1, 1]} : vector<8x8x384xf32> to vector<8x8x128xf32>
    %c6_i32 = arith.constant 6 : i32
    %21 = tpu.dynamic_rotate %20 by %c6_i32 dim 1 : vector<8x8x128xf32>, i32 -> vector<8x8x128xf32>
    %22 = arith.addf %19, %21 : vector<8x8x128xf32>
    %c0_8 = arith.constant 0 : index
    %c0_9 = arith.constant 0 : index
    %c0_10 = arith.constant 0 : index
    %23 = vector.load %arg4[%c0_8, %c0_9, %c0_10] : memref<1x8x128xf32, #tpu.memory_space<vmem>>, vector<1x8x128xf32>
    %24 = vector.broadcast %23 : vector<1x8x128xf32> to vector<8x8x128xf32>
    %25 = arith.addf %22, %24 : vector<8x8x128xf32>
    %cst_11 = arith.constant dense<0xFF800000> : vector<8x128xf32>
    %26 = vector.multi_reduction <maximumf>, %25, %cst_11 [1] : vector<8x8x128xf32> to vector<8x128xf32>
    %c0_12 = arith.constant 0 : index
    %c0_13 = arith.constant 0 : index
    %27 = vector.load %arg5[%c0_12, %c0_13] : memref<1x128xf32, #tpu.memory_space<vmem>>, vector<1x128xf32>
    %28 = vector.broadcast %27 : vector<1x128xf32> to vector<8x128xf32>
    %29 = arith.addf %26, %28 : vector<8x128xf32>
    %30 = arith.truncf %29 : vector<8x128xf32> to vector<8x128xbf16>
    %c0_14 = arith.constant 0 : index
    %c0_15 = arith.constant 0 : index
    %31 = vector.load %arg6[%c0_14, %c0_15] : memref<128x128xbf16, #tpu.memory_space<vmem>>, vector<128x128xbf16>
    %cst_16 = arith.constant dense<0.000000e+00> : vector<8x128xf32>
    %32 = tpu.matmul %30, %31, %cst_16 {dimension_numbers = #tpu.dot_dimension_numbers<[1], [0], [0], [1], [0, 0, 1, 1], [], []>} : vector<8x128xbf16>, vector<128x128xbf16>, vector<8x128xf32> -> vector<8x128xf32>
    %c0_17 = arith.constant 0 : index
    %c0_18 = arith.constant 0 : index
    %33 = vector.load %arg7[%c0_17, %c0_18] : memref<1x128xf32, #tpu.memory_space<vmem>>, vector<1x128xf32>
    %34 = vector.broadcast %33 : vector<1x128xf32> to vector<8x128xf32>
    %35 = arith.addf %32, %34 : vector<8x128xf32>
    %c0_19 = arith.constant 0 : index
    %c0_20 = arith.constant 0 : index
    %36 = vector.load %arg8[%c0_19, %c0_20] : memref<8x128xf32, #tpu.memory_space<vmem>>, vector<8x128xf32>
    tpu.vector_store %arg8[%c0_19, %c0_20], %35 {strides = array<i32>} : memref<8x128xf32, #tpu.memory_space<vmem>>, vector<8x128xf32>,
    return
  }
  func.func @transform_0(%arg0: i32) -> (i32, i32) {
    %c0_i32 = arith.constant 0 : i32
    %c0_i32_0 = arith.constant 0 : i32
    return %arg0, %c0_i32 : i32, i32
  }
  func.func @transform_1(%arg0: i32) -> (i32, i32) {
    %c0_i32 = arith.constant 0 : i32
    %c0_i32_0 = arith.constant 0 : i32
    %c0_i32_1 = arith.constant 0 : i32
    return %c0_i32, %c0_i32_0 : i32, i32
  }
  func.func @transform_2(%arg0: i32) -> (i32, i32) {
    %c0_i32 = arith.constant 0 : i32
    %c0_i32_0 = arith.constant 0 : i32
    %c0_i32_1 = arith.constant 0 : i32
    return %c0_i32, %c0_i32_0 : i32, i32
  }
  func.func @transform_3(%arg0: i32) -> (i32, i32, i32) {
    %c0_i32 = arith.constant 0 : i32
    %c0_i32_0 = arith.constant 0 : i32
    %c0_i32_1 = arith.constant 0 : i32
    %c0_i32_2 = arith.constant 0 : i32
    return %c0_i32, %c0_i32_0, %c0_i32_1 : i32, i32, i32
  }
  func.func @transform_4(%arg0: i32) -> (i32, i32) {
    %c0_i32 = arith.constant 0 : i32
    %c0_i32_0 = arith.constant 0 : i32
    %c0_i32_1 = arith.constant 0 : i32
    return %c0_i32, %c0_i32_0 : i32, i32
  }
  func.func @transform_5(%arg0: i32) -> (i32, i32) {
    %c0_i32 = arith.constant 0 : i32
    %c0_i32_0 = arith.constant 0 : i32
    %c0_i32_1 = arith.constant 0 : i32
    return %c0_i32, %c0_i32_0 : i32, i32
  }
  func.func @transform_6(%arg0: i32) -> (i32, i32) {
    %c0_i32 = arith.constant 0 : i32
    %c0_i32_0 = arith.constant 0 : i32
    %c0_i32_1 = arith.constant 0 : i32
    return %c0_i32, %c0_i32_0 : i32, i32
  }
  func.func @transform_7(%arg0: i32) -> (i32, i32) {
    %c0_i32 = arith.constant 0 : i32
    %c0_i32_0 = arith.constant 0 : i32
    return %arg0, %c0_i32 : i32, i32
  }
}

</mosaic_0001>

<bundles_post_ra>
// kernel: tpu_custom_call.1
= control target key start
LH: loop header
LB: loop body
LE: loop exit
PB: predicated region body
PF: predicated region fallthrough
CT: control target
= control target key end

     0   :  { %12 = vsyncpa [#allocation3], 0  ;;  %s1394_s0 = inlined_call_operand.hbm [shape: s32[8,8], index: 0, kind: input, shape index: {}]   ;;  %s1395_s1 = inlined_call_operand.hbm [shape: bf16[128,128], index: 1, kind: input, shape index: {}]   ;;  %s1396_s2 = inlined_call_operand.hbm [shape: bf16[128,384], index: 2, kind: input, shape index: {}]   ;;  %s1397_s3 = inlined_call_operand.vmem [shape: f32[1,8,128], index: 3, kind: input, shape index: {}]   ;;  %s1398_s4 = inlined_call_operand.vmem [shape: f32[1,128], index: 4, kind: input, shape index: {}]   ;;  %s1399_s5 = inlined_call_operand.hbm [shape: bf16[128,128], index: 5, kind: input, shape index: {}]   ;;  %s1400_s6 = inlined_call_operand.vmem [shape: f32[1,128], index: 6, kind: input, shape index: {}]   ;;  %s1401_s7 = inlined_call_operand.hbm [shape: f32[8,128], index: 7, kind: output, shape index: {}]  }
   0x1   :  { %13 = vsyncpa [#allocation6], 0 }
   0x2   :  { %14 = vsyncpa [#allocation9], 0 }
   0x3   :  { %15 = vsyncpa [#allocation4], 0  ;;  %s1237_s24 = smov [#allocation5]   ;;  %s1119_s28 = scalar_lea.hbm %s1395_s1, 1024 }
   0x4   :  { %s31_s25 = sshll.u32 %s1237_s24, 4  ;;  %p1120_p0 = scmp.ne.s32.totalorder %s1395_s1, %s1119_s28  ;;  %s32_s25 = int_to_ptr.vmem [resolvable:$true] %s31_s25 }
   0x5   :  { %p1123_p1 = scmp.lt.u32.totalorder %s1119_s28, %s1395_s1 }
   0x7   :  { %p1125_p2 = pnand %p1123_p1, %p1120_p0 }
   0x9   :  { %1128 = shalt.err (!%p1125_p2)
}
   0xa   :  { %s1129_s10 = scalar_lea.vmem %s32_s25, 1024  ;;  %p1134_p4 = scmp.lt.s32.totalorder %s32_s25, %s32_s25 }
   0xb   :  { %p1130_p3 = scmp.ne.s32.totalorder %s32_s25, %s1129_s10  ;;  %p1135_p5 = scmp.lt.s32.totalorder %s1129_s10, %s1129_s10 }
   0xd   :  { %p1136_p6 = por %p1135_p5, %p1134_p4 }
   0xf   :  { %p1137_p7 = pnand %p1136_p6, %p1130_p3 }
  0x11   :  { %1140 = shalt.err (!%p1137_p7)
}
  0x12   :  { %s1238_s11 = smov 64   ;;  %s1239_s12 = smov 4  }
  0x13   :  { %37 = dma.hbm_to_vmem [thread:$0]  %s1395_s1, 1024, %s32_s25, [#allocation6], %s1238_s11, %s1238_s11, %s1239_s12  }
  0x14   :  { %s1240_s15 = smov [#allocation2]   ;;  %s1241_s17 = smov [#allocation7]  }
  0x15   :  { %s22_s16 = sshll.u32 %s1240_s15, 4  ;;  %s43_s18 = sshll.u32 %s1241_s17, 4  ;;  %s23_s16 = int_to_ptr.vmem [resolvable:$true] %s22_s16  ;;  %s44_s18 = int_to_ptr.vmem [resolvable:$true] %s43_s18 }
  0x16   :  { %s1141_s21 = scalar_lea.hbm %s1394_s0, 128 }
  0x17   :  { %p1142_p8 = scmp.ne.s32.totalorder %s1394_s0, %s1141_s21  ;;  %p1145_p9 = scmp.lt.u32.totalorder %s1141_s21, %s1394_s0 }
  0x19   :  { %p1147_p10 = pnand %p1145_p9, %p1142_p8 }
  0x1b   :  { %1150 = shalt.err (!%p1147_p10)
}
  0x1c   :  { %s1151_s1 = scalar_lea.vmem %s23_s16, 128  ;;  %p1156_p12 = scmp.lt.s32.totalorder %s23_s16, %s23_s16 }
  0x1d   :  { %p1152_p11 = scmp.ne.s32.totalorder %s23_s16, %s1151_s1  ;;  %p1157_p13 = scmp.lt.s32.totalorder %s1151_s1, %s1151_s1 }
  0x1f   :  { %p1158_p0 = por %p1157_p13, %p1156_p12 }
  0x21   :  { %p1159_p1 = pnand %p1158_p0, %p1152_p11 }
  0x23   :  { %1162 = shalt.err (!%p1159_p1)
}
  0x24   :  { %25 = dma.hbm_to_vmem [thread:$0]  %s1394_s0, 128, %s23_s16, [#allocation3]  }
  0x25   :  { %s1163_s30 = scalar_lea.hbm %s1396_s2, 3072 }
  0x26   :  { %p1164_p2 = scmp.ne.s32.totalorder %s1396_s2, %s1163_s30  ;;  %p1167_p3 = scmp.lt.u32.totalorder %s1163_s30, %s1396_s2 }
  0x28   :  { %p1169_p4 = pnand %p1167_p3, %p1164_p2 }
  0x2a   :  { %1172 = shalt.err (!%p1169_p4)
}
  0x2b   :  { %s1173_s14 = scalar_lea.vmem %s44_s18, 3072  ;;  %p1178_p6 = scmp.lt.s32.totalorder %s44_s18, %s44_s18 }
  0x2c   :  { %p1174_p5 = scmp.ne.s32.totalorder %s44_s18, %s1173_s14  ;;  %p1179_p7 = scmp.lt.s32.totalorder %s1173_s14, %s1173_s14 }
  0x2e   :  { %p1180_p8 = por %p1179_p7, %p1178_p6 }
  0x30   :  { %p1181_p9 = pnand %p1180_p8, %p1174_p5 }
  0x32   :  { %1184 = shalt.err (!%p1181_p9)
}
  0x33   :  { %s1242_s0 = smov 192   ;;  %s1243_s15 = smov 12  }
  0x34   :  { %49 = dma.hbm_to_vmem [thread:$0]  %s1396_s2, 3072, %s44_s18, [#allocation6], %s1242_s0, %s1242_s0, %s1243_s15  }
  0x35   :  { %s1244_s19 = smov [#allocation8]   ;;  %s1185_s23 = scalar_lea.hbm %s1399_s5, 1024 }
  0x36   :  { %s59_s20 = sshll.u32 %s1244_s19, 4  ;;  %p1186_p10 = scmp.ne.s32.totalorder %s1399_s5, %s1185_s23  ;;  %s60_s20 = int_to_ptr.vmem [resolvable:$true] %s59_s20 }
  0x37   :  { %p1189_p11 = scmp.lt.u32.totalorder %s1185_s23, %s1399_s5 }
  0x39   :  { %p1191_p12 = pnand %p1189_p11, %p1186_p10 }
  0x3b   :  { %1194 = shalt.err (!%p1191_p12)
}
  0x3c   :  { %s1195_s27 = scalar_lea.vmem %s60_s20, 1024  ;;  %p1200_p0 = scmp.lt.s32.totalorder %s60_s20, %s60_s20 }
  0x3d   :  { %p1196_p13 = scmp.ne.s32.totalorder %s60_s20, %s1195_s27  ;;  %p1201_p1 = scmp.lt.s32.totalorder %s1195_s27, %s1195_s27 }
  0x3f   :  { %p1202_p2 = por %p1201_p1, %p1200_p0 }
  0x41   :  { %p1203_p3 = pnand %p1202_p2, %p1196_p13 }
  0x43   :  { %1206 = shalt.err (!%p1203_p3)
}
  0x44   :  { %65 = dma.hbm_to_vmem [thread:$0]  %s1399_s5, 1024, %s60_s20, [#allocation9], %s1238_s11, %s1238_s11, %s1239_s12  }
  0x45   :  { %1229 = dma.done.wait [#allocation3], 128  }
  0x46   :  { %1230 = vsyncadd [#allocation3], 4294967168 }
  0x47   :  { %1231 = dma.done.wait [#allocation6], 4096  }
  0x48   :  { %1232 = vsyncadd [#allocation6], 4294963200 }
  0x49   :  { %1233 = dma.done.wait [#allocation9], 1024  }
  0x4a   :  { %1234 = vsyncadd [#allocation9], 4294966272  ;;  %v82_v0 = vlaneseq  ;;  %v81_v6 = vld [vmem:[#allocation2] sm:$0xff]  ;;  %v1071_v9 = vld [vmem:[#allocation5] sm:$0xff]   ;;  %v1245_v48 = vmov 1.0|1.0  }
  0x4b   :  { %v1072_v10 = vld [vmem:[#allocation5 + $0x8] sm:$0xff]   ;;  %990 = vmatprep.subr.bf16.mxu0 %v1071_v9  ;;  %v1073_v15 = vld [vmem:[#allocation5 + $0x10] sm:$0xff]   ;;  %v1074_v22 = vld [vmem:[#allocation5 + $0x18] sm:$0xff]   ;;  %v1246_v61 = vmov 0   ;;  %vm1248_vm12 = vmmov 0   ;;  %vm771_vm13 = vcmask 1041409  }
  0x4c   :  { %v85_v1 = vshrl.u32 %v82_v0, 7  ;;  %991 = vmatpush3.bf16.msra.mxu0 %v1071_v9  ;;  %v1079_v20 = vld [vmem:[#allocation7 + $0x4] ss:$12 sps:$4 sm:$0xff]   ;;  %v1081_v21 = vld [vmem:[#allocation7] ss:$12 sps:$4 sm:$0xff]   ;;  %v1078_v36 = vld [vmem:[#allocation5 + $0x38] sm:$0xff]   ;;  %513 = vmatprep.mubr.bf16.mxu1 %v1246_v61 }
  0x4d   :  { %992 = vmatprep.subr.bf16.mxu0 %v1072_v10  ;;  %v1083_v25 = vld [vmem:[#allocation7 + $0x1c] ss:$12 sps:$4 sm:$0xff]   ;;  %481 = vmatprep.subr.bf16.mxu1 %v1079_v20  ;;  %v1075_v26 = vld [vmem:[#allocation5 + $0x20] sm:$0xff]   ;;  %v1091_v31 = vld [vmem:[#allocation7 + $0x4c] ss:$12 sps:$4 sm:$0xff]   ;;  %v83_v44 = vand.u32 127, %v82_v0 }
  0x4e   :  { %v100_v2 = vsub.s32 2, %v85_v1  ;;  %v86_v3 = vsub.s32 0, %v85_v1  ;;  %v107_v4 = vsub.s32 3, %v85_v1  ;;  %v93_v5 = vsub.s32 1, %v85_v1  ;;  %482 = vmatpush1.bf16.msra.mxu1 %v1081_v21  ;;  %v1085_v27 = vld [vmem:[#allocation7 + $0x18] ss:$12 sps:$4 sm:$0xff]  }
  0x4f   :  { %v121_v13 = vsub.s32 5, %v85_v1  ;;  %v114_v14 = vsub.s32 4, %v85_v1  ;;  %v135_v18 = vsub.s32 7, %v85_v1  ;;  %v128_v19 = vsub.s32 6, %v85_v1  ;;  %483 = vmatprep.subr.bf16.mxu1 %v1083_v25  ;;  %v1087_v28 = vld [vmem:[#allocation7 + $0x34] ss:$12 sps:$4 sm:$0xff]  }
  0x50   :  { %v101_v7 = vrot.slane %v81_v6, %v100_v2  ;;  %v87_v8 = vrot.slane %v81_v6, %v86_v3  ;;  %v108_v11 = vrot.slane %v81_v6, %v107_v4  ;;  %v94_v12 = vrot.slane %v81_v6, %v93_v5  ;;  %993 = vmatpush3.bf16.msra.mxu0 %v1072_v10  ;;  %v1089_v29 = vld [vmem:[#allocation7 + $0x30] ss:$12 sps:$4 sm:$0xff]   ;;  %v1076_v30 = vld [vmem:[#allocation5 + $0x28] sm:$0xff]   ;;  %v1101_v38 = vld [vmem:[#allocation7 + $0x78] ss:$12 sps:$4 sm:$0xff]   ;;  %s1249_s29 = smov [#allocation10]  }
  0x51   :  { %v122_v16 = vrot.slane %v81_v6, %v121_v13  ;;  %v115_v17 = vrot.slane %v81_v6, %v114_v14  ;;  %994 = vmatprep.subr.bf16.mxu0 %v1073_v15  ;;  %v136_v23 = vrot.slane %v81_v6, %v135_v18  ;;  %v129_v24 = vrot.slane %v81_v6, %v128_v19  ;;  %v1077_v32 = vld [vmem:[#allocation5 + $0x30] sm:$0xff]   ;;  %v1097_v35 = vld [vmem:[#allocation7 + $0x60] ss:$12 sps:$4 sm:$0xff]   ;;  %v1099_v37 = vld [vmem:[#allocation7 + $0x7c] ss:$12 sps:$4 sm:$0xff]   ;;  %s888_s30 = sshll.u32 %s1249_s29, 4  ;;  %s889_s30 = int_to_ptr.vmem [resolvable:$true] %s888_s30 }
  0x52   :  { %103 = vbcast.lane.b32.xlu1 %v101_v7, 256  ;;  %89 = vbcast.lane.b32.xlu0 %v87_v8, 256  ;;  %v1093_v33 = vld [vmem:[#allocation7 + $0x48] ss:$12 sps:$4 sm:$0xff]   ;;  %v1095_v34 = vld [vmem:[#allocation7 + $0x64] ss:$12 sps:$4 sm:$0xff]   ;;  %p1212_p5 = scmp.lt.s32.totalorder %s889_s30, %s889_s30 }
  0x53   :  { %484 = vmatpush1.bf16.msra.mxu1 %v1085_v27  ;;  %v1082_v39 = vld [vmem:[#allocation7 + $0x8] ss:$12 sps:$4 sm:$0xff]   ;;  %v1105_v41 = vld [vmem:[#allocation7 + $0x90] ss:$12 sps:$4 sm:$0xff]   ;;  %v1086_v47 = vld [vmem:[#allocation7 + $0x20] ss:$12 sps:$4 sm:$0xff]  }
  0x54   :  { %995 = vmatpush3.bf16.msra.mxu0 %v1073_v15  ;;  %485 = vmatprep.subr.bf16.mxu1 %v1087_v28  ;;  %v1103_v40 = vld [vmem:[#allocation7 + $0x94] ss:$12 sps:$4 sm:$0xff]   ;;  %v1090_v51 = vld [vmem:[#allocation7 + $0x38] ss:$12 sps:$4 sm:$0xff]   ;;  %v1094_v54 = vld [vmem:[#allocation7 + $0x50] ss:$12 sps:$4 sm:$0xff]  }
  0x55   :  { %996 = vmatprep.subr.bf16.mxu0 %v1074_v22  ;;  %v1098_v55 = vld [vmem:[#allocation7 + $0x68] ss:$12 sps:$4 sm:$0xff]   ;;  %v1102_v56 = vld [vmem:[#allocation7 + $0x80] ss:$12 sps:$4 sm:$0xff]   ;;  %v1106_v57 = vld [vmem:[#allocation7 + $0x98] ss:$12 sps:$4 sm:$0xff]  }
  0x56   :  { %110 = vbcast.lane.b32.xlu1 %v108_v11, 256  ;;  %96 = vbcast.lane.b32.xlu0 %v94_v12, 256  ;;  %v1107_v58 = vld [vmem:[#allocation7 + $0xac] ss:$12 sps:$4 sm:$0xff]   ;;  %v1109_v59 = vld [vmem:[#allocation7 + $0xa8] ss:$12 sps:$4 sm:$0xff]  }
  0x57   :  { %486 = vmatpush1.bf16.msra.mxu1 %v1089_v29  ;;  %v1110_v60 = vld [vmem:[#allocation7 + $0xb0] ss:$12 sps:$4 sm:$0xff]   ;;  %v1111_v10 = vld [vmem:[#allocation8] sm:$0xff]   ;;  %v1247_v11 = vmov 0.0   ;;  %v1112_v12 = vld [vmem:[#allocation8 + $0x8] sm:$0xff]   ;;  %vm774_vm14 = vcmask 1042434  }
  0x58   :  { %997 = vmatpush3.bf16.msra.mxu0 %v1074_v22  ;;  %487 = vmatprep.subr.bf16.mxu1 %v1091_v31  ;;  %v1113_v13 = vld [vmem:[#allocation8 + $0x10] sm:$0xff]   ;;  %v1114_v14 = vld [vmem:[#allocation8 + $0x18] sm:$0xff]   ;;  %v1115_v15 = vld [vmem:[#allocation8 + $0x20] sm:$0xff]   ;;  %vm777_vm15 = vcmask 1043459   ;;  %s1207_s8 = scalar_lea.vmem %s889_s30, 128 }
  0x59   :  { %998 = vmatprep.subr.bf16.mxu0 %v1075_v26  ;;  %v1118_v18 = vld [vmem:[#allocation8 + $0x38] sm:$0xff]   ;;  %p1208_p4 = scmp.ne.s32.totalorder %s889_s30, %s1207_s8  ;;  %p1213_p6 = scmp.lt.s32.totalorder %s1207_s8, %s1207_s8 }
  0x5a   :  { %124 = vbcast.lane.b32.xlu1 %v122_v16, 256  ;;  %117 = vbcast.lane.b32.xlu0 %v115_v17, 256  ;;  %v1116_v16 = vld [vmem:[#allocation8 + $0x28] sm:$0xff]   ;;  %v1117_v17 = vld [vmem:[#allocation8 + $0x30] sm:$0xff]   ;;  %v1349_v31 = vld [vmem:[%s1397_s3] sm:$0xff] }
  0x5b   :  { %488 = vmatpush1.bf16.msra.mxu1 %v1093_v33  ;;  %p1214_p7 = por %p1213_p6, %p1212_p5 }
  0x5c   :  { %999 = vmatpush3.bf16.msra.mxu0 %v1075_v26  ;;  %489 = vmatprep.subr.bf16.mxu1 %v1095_v34 }
  0x5d   :  { %1000 = vmatprep.subr.bf16.mxu0 %v1076_v30  ;;  %p1215_p8 = pnand %p1214_p7, %p1208_p4 }
  0x5e   :  { %138 = vbcast.lane.b32.xlu1 %v136_v23, 256  ;;  %131 = vbcast.lane.b32.xlu0 %v129_v24, 256 }
  0x5f   :  { %490 = vmatpush1.bf16.msra.mxu1 %v1097_v35 }
  0x60   :  { %1001 = vmatpush3.bf16.msra.mxu0 %v1076_v30  ;;  %491 = vmatprep.subr.bf16.mxu1 %v1099_v37 }
  0x61   :  { %1002 = vmatprep.subr.bf16.mxu0 %v1077_v32 }
  0x63   :  { %492 = vmatpush1.bf16.msra.mxu1 %v1101_v38 }
  0x64   :  { %1003 = vmatpush3.bf16.msra.mxu0 %v1077_v32  ;;  %493 = vmatprep.subr.bf16.mxu1 %v1103_v40 }
  0x65   :  { %1004 = vmatprep.subr.bf16.mxu0 %v1078_v36 }
  0x67   :  { %494 = vmatpush1.bf16.msra.mxu1 %v1105_v41 }
  0x68   :  { %1005 = vmatpush3.bf16.msra.mxu0 %v1078_v36  ;;  %495 = vmatprep.subr.bf16.mxu1 %v1107_v58 }
  0x69   :  { %1014 = vmatprep.subr.bf16.mxu0 %v1082_v39 }
  0x6b   :  { %496 = vmatpush1.bf16.msra.mxu1 %v1109_v59 }
  0x6c   :  { %1038 = vmatprep.subr.bf16.mxu1 %v1247_v11 }
  0xc4   :  { %v104_v42 = vpop.permute.xlu1 %103  ;;  %v90_v43 = vpop.permute.xlu0 %89 }
  0xc5   :  { %vm142_vm0 = vcmp.eq.s32.totalorder %v104_v42, %v83_v44  ;;  %vm140_vm3 = vcmp.eq.s32.totalorder %v90_v43, %v83_v44 }
  0xc8   :  { %v111_v45 = vpop.permute.xlu1 %110  ;;  %v97_v46 = vpop.permute.xlu0 %96 }
  0xc9   :  { %vm143_vm1 = vcmp.eq.s32.totalorder %v111_v45, %v83_v44  ;;  %vm141_vm2 = vcmp.eq.s32.totalorder %v97_v46, %v83_v44 }
  0xca   :  { %vm951_vm4 = vmpackc.low %vm143_vm1, %vm142_vm0  ;;  %vm780_vm0 = vcmask 1044484   ;;  %vm783_vm1 = vcmask 1045509  }
  0xcb   :  { %vm949_vm5 = vmpackc.low %vm141_vm2, %vm140_vm3  ;;  %vm786_vm2 = vcmask 1046534   ;;  %vm789_vm3 = vcmask 1047559  }
  0xcc   :  { %1006 = vmatprep.mubr.msk.bf16.mxu0 %vm949_vm5, %v1245_v48  ;;  %v125_v49 = vpop.permute.xlu1 %124  ;;  %v118_v50 = vpop.permute.xlu0 %117 }
  0xcd   :  { %1007 = vmatmul.mubr.msk.bf16.vlgmr.msra.gmra.mrb[0].mxu0 %vm951_vm4, %v1245_v48  ;;  %vm145_vm6 = vcmp.eq.s32.totalorder %v125_v49, %v83_v44  ;;  %vm144_vm7 = vcmp.eq.s32.totalorder %v118_v50, %v83_v44 }
  0xce   :  { %vm953_vm8 = vmpackc.low %vm145_vm6, %vm144_vm7  ;;  %1015 = vmatpush3.bf16.msra.mxu0 %v1082_v39 }
  0xcf   :  { %1010 = vmatprep.mubr.msk.bf16.mxu0 %vm953_vm8, %v1245_v48  ;;  %1016 = vmatprep.subr.bf16.mxu0 %v1086_v47 }
  0xd0   :  { %v139_v52 = vpop.permute.xlu1 %138  ;;  %v132_v53 = vpop.permute.xlu0 %131 }
  0xd1   :  { %vm147_vm9 = vcmp.eq.s32.totalorder %v139_v52, %v83_v44  ;;  %vm146_vm10 = vcmp.eq.s32.totalorder %v132_v53, %v83_v44 }
  0xd2   :  { %vm955_vm11 = vmpackc.low %vm147_vm9, %vm146_vm10  ;;  %1017 = vmatpush3.bf16.msra.mxu0 %v1086_v47 }
  0xd3   :  { %1018 = vmatprep.subr.bf16.mxu0 %v1090_v51 }
  0xd5   :  { %1011 = vmatmul.mubr.msk.bf16.gmra.mrb[4].mxu0 %vm955_vm11, %v1245_v48 }
  0xd6   :  { %1019 = vmatpush3.bf16.msra.mxu0 %v1090_v51 }
  0xd7   :  { %1020 = vmatprep.subr.bf16.mxu0 %v1094_v54 }
  0xda   :  { %1021 = vmatpush3.bf16.msra.mxu0 %v1094_v54 }
  0xdb   :  { %1022 = vmatprep.subr.bf16.mxu0 %v1098_v55 }
  0xde   :  { %1023 = vmatpush3.bf16.msra.mxu0 %v1098_v55 }
  0xdf   :  { %1024 = vmatprep.subr.bf16.mxu0 %v1102_v56 }
  0xe2   :  { %1025 = vmatpush3.bf16.msra.mxu0 %v1102_v56 }
  0xe3   :  { %1026 = vmatprep.subr.bf16.mxu0 %v1106_v57 }
  0xe6   :  { %1027 = vmatpush3.bf16.msra.mxu0 %v1106_v57 }
  0xe7   :  { %1028 = vmatprep.subr.bf16.mxu0 %v1110_v60 }
  0xea   :  { %1029 = vmatpush3.bf16.msra.mxu0 %v1110_v60 }
 0x1a0   :  { %v1008_v62 = vpop.f32.mrb[0].mxu0 }
 0x1a1   :  { %v286_v63 = vpop.f32.mrb[1].mxu0 }
 0x1a2   :  { %v1009_v0 = vpop.f32.mrb[2].mxu0 }
 0x1a3   :  { %v318_v1 = vpack.c.bf16 %v1009_v0, %v1008_v62  ;;  %v289_v2 = vpop.f32.mrb[3].mxu0 }
 0x1a4   :  { %v317_v3 = vpack.c.bf16 %v289_v2, %v286_v63 }
 0x1a6   :  { %514 = vmatmul.mubr.bf16.vlgmr.msra.gmra.mrb[0].mxu1 %v317_v3  ;;  %1030 = vmatprep.mubr.bf16.mxu0 %v317_v3 }
 0x1a7   :  { %1031 = vmatmul.mubr.bf16.vlgmr.msra.gmra.mrb[8].mxu0 %v318_v1  ;;  %523 = vmatprep.mubr.bf16.mxu1 %v1246_v61 }
 0x1a8   :  { %v1012_v4 = vpop.f32.mrb[4].mxu0  ;;  %1039 = vmatpush3.bf16.msra.mxu1 %v1111_v10 }
 0x1a9   :  { %v302_v5 = vpop.f32.mrb[5].mxu0  ;;  %1040 = vmatprep.subr.bf16.mxu1 %v1247_v11 }
 0x1aa   :  { %v1013_v6 = vpop.f32.mrb[6].mxu0 }
 0x1ab   :  { %v320_v7 = vpack.c.bf16 %v1013_v6, %v1012_v4  ;;  %v305_v8 = vpop.f32.mrb[7].mxu0 }
 0x1ac   :  { %v319_v9 = vpack.c.bf16 %v305_v8, %v302_v5  ;;  %1041 = vmatpush3.bf16.msra.mxu1 %v1112_v12  ;;  %v1362_v5 = vld [vmem:[%s1398_s4] ss:$0 sm:$0xff] }
 0x1ad   :  { %1042 = vmatprep.subr.bf16.mxu1 %v1247_v11 }
 0x1ae   :  { %524 = vmatmul.mubr.bf16.gmra.mrb[4].mxu1 %v318_v1  ;;  %1034 = vmatprep.mubr.bf16.mxu0 %v319_v9 }
 0x1af   :  { %1035 = vmatmul.mubr.bf16.gmra.mrb[12].mxu0 %v320_v7  ;;  %533 = vmatprep.mubr.bf16.mxu1 %v1246_v61 }
 0x1b0   :  { %1043 = vmatpush3.bf16.msra.mxu1 %v1113_v13 }
 0x1b1   :  { %1044 = vmatprep.subr.bf16.mxu1 %v1247_v11 }
 0x1b4   :  { %1045 = vmatpush3.bf16.msra.mxu1 %v1114_v14 }
 0x1b5   :  { %1046 = vmatprep.subr.bf16.mxu1 %v1247_v11 }
 0x1b6   :  { %534 = vmatmul.mubr.bf16.gmra.mrb[8].mxu1 %v319_v9 }
 0x1b7   :  { %543 = vmatprep.mubr.bf16.mxu1 %v1246_v61 }
 0x1b8   :  { %1047 = vmatpush3.bf16.msra.mxu1 %v1115_v15 }
 0x1b9   :  { %1048 = vmatprep.subr.bf16.mxu1 %v1247_v11 }
 0x1bc   :  { %1049 = vmatpush3.bf16.msra.mxu1 %v1116_v16 }
 0x1bd   :  { %1050 = vmatprep.subr.bf16.mxu1 %v1247_v11 }
 0x1be   :  { %544 = vmatmul.mubr.bf16.gmra.mrb[12].mxu1 %v320_v7 }
 0x1bf   :  { %1054 = vmatprep.mubr.msk.bf16.mxu1 %vm1248_vm12, %v1247_v11 }
 0x1c0   :  { %1051 = vmatpush3.bf16.msra.mxu1 %v1117_v17 }
 0x1c1   :  { %1052 = vmatprep.subr.bf16.mxu1 %v1247_v11 }
 0x1c4   :  { %1053 = vmatpush3.bf16.msra.mxu1 %v1118_v18 }
 0x279   :  { %v515_v19 = vpop.f32.mrb[0].mxu1 }
 0x27a   :  { %v517_v20 = vpop.f32.mrb[1].mxu1  ;;  %v1032_v21 = vpop.f32.mrb[8].mxu0 }
 0x27b   :  { %v619_v22 = vrot.slane %v517_v20, 1  ;;  %v519_v23 = vpop.f32.mrb[2].mxu1  ;;  %v588_v24 = vpop.f32.mrb[9].mxu0  ;;  %v637_v45 = vrot.slane %v1032_v21, 2 }
 0x27c   :  { %v635_v25 = vrot.slane %v588_v24, 2  ;;  %v521_v26 = vpop.f32.mrb[3].mxu1  ;;  %v1033_v27 = vpop.f32.mrb[10].mxu0 }
 0x27d   :  { %v627_v28 = vadd.f32 %v619_v22, %v515_v19  ;;  %v620_v29 = vrot.slane %v521_v26, 1  ;;  %v591_v30 = vpop.f32.mrb[11].mxu0  ;;  %v638_v53 = vrot.slane %v1033_v27, 2 }
 0x27e   :  { %v636_v32 = vrot.slane %v591_v30, 2 }
 0x27f   :  { %v643_v33 = vadd.f32 %v635_v25, %v627_v28  ;;  %v628_v34 = vadd.f32 %v620_v29, %v519_v23 }
 0x281   :  { %v652_v35 = vadd.f32 %v1349_v31, %v643_v33  ;;  %v644_v36 = vadd.f32 %v636_v32, %v628_v34  ;;  %v525_v37 = vpop.f32.mrb[4].mxu1 }
 0x282   :  { %v527_v38 = vpop.f32.mrb[5].mxu1  ;;  %v1352_v39 = vpop.f32.mrb[12].mxu0 }
 0x283   :  { %v660_v40 = vrot.slane %v652_v35, 4  ;;  %v653_v41 = vadd.f32 %v1349_v31, %v644_v36  ;;  %v621_v42 = vrot.slane %v527_v38, 1  ;;  %v529_v43 = vpop.f32.mrb[6].mxu1  ;;  %v604_v44 = vpop.f32.mrb[13].mxu0  ;;  %v641_v33 = vrot.slane %v1352_v39, 2 }
 0x284   :  { %v531_v46 = vpop.f32.mrb[7].mxu1  ;;  %v1355_v47 = vpop.f32.mrb[14].mxu0  ;;  %v639_v12 = vrot.slane %v604_v44, 2 }
 0x285   :  { %v661_v48 = vmax.f32 %v652_v35, %v660_v40  ;;  %v666_v49 = vrot.slane %v653_v41, 4  ;;  %v629_v50 = vadd.f32 %v621_v42, %v525_v37  ;;  %v622_v51 = vrot.slane %v531_v46, 1  ;;  %v607_v52 = vpop.f32.mrb[15].mxu0 }
 0x286   :  { %v640_v19 = vrot.slane %v607_v52, 2  ;;  %v642_v36 = vrot.slane %v1355_v47, 2 }
 0x287   :  { %v662_v54 = vrot.slane %v661_v48, 2  ;;  %v667_v55 = vmax.f32 %v653_v41, %v666_v49  ;;  %v645_v56 = vadd.f32 %v637_v45, %v629_v50  ;;  %v630_v57 = vadd.f32 %v622_v51, %v529_v43 }
 0x289   :  { %v663_v58 = vmax.f32 %v661_v48, %v662_v54  ;;  %v668_v59 = vrot.slane %v667_v55, 2  ;;  %v654_v60 = vadd.f32 %v1349_v31, %v645_v56  ;;  %v646_v61 = vadd.f32 %v638_v53, %v630_v57  ;;  %v535_v62 = vpop.f32.mrb[8].mxu1 }
 0x28a   :  { %v537_v63 = vpop.f32.mrb[9].mxu1 }
 0x28b   :  { %v664_v0 = vrot.slane %v663_v58, 1  ;;  %v669_v1 = vmax.f32 %v667_v55, %v668_v59  ;;  %v672_v2 = vrot.slane %v654_v60, 4  ;;  %v655_v3 = vadd.f32 %v1349_v31, %v646_v61  ;;  %v539_v4 = vpop.f32.mrb[10].mxu1 }
 0x28c   :  { %v623_v6 = vrot.slane %v537_v63, 1  ;;  %v541_v7 = vpop.f32.mrb[11].mxu1 }
 0x28d   :  { %v665_v8 = vmax.f32 %v663_v58, %v664_v0  ;;  %v670_v9 = vrot.slane %v669_v1, 1  ;;  %v673_v10 = vmax.f32 %v654_v60, %v672_v2  ;;  %v678_v11 = vrot.slane %v655_v3, 4 }
 0x28e   :  { %v631_v13 = vadd.f32 %v623_v6, %v535_v62  ;;  %v624_v14 = vrot.slane %v541_v7, 1 }
 0x28f   :  { %v715_v15 = vadd.f32 %v1362_v5, %v665_v8  ;;  %v671_v16 = vmax.f32 %v669_v1, %v670_v9  ;;  %v674_v17 = vrot.slane %v673_v10, 2  ;;  %v679_v18 = vmax.f32 %v655_v3, %v678_v11 }
 0x290   :  { %v647_v20 = vadd.f32 %v639_v12, %v631_v13  ;;  %v632_v21 = vadd.f32 %v624_v14, %v539_v4 }
 0x291   :  { %v716_v22 = vadd.f32 %v1362_v5, %v671_v16  ;;  %v675_v23 = vmax.f32 %v673_v10, %v674_v17  ;;  %v680_v24 = vrot.slane %v679_v18, 2  ;;  %v545_v25 = vpop.f32.mrb[12].mxu1  ;;  %v723_v26 = vpack.c.bf16 %v715_v15, %v715_v15 }
 0x292   :  { %v656_v27 = vadd.f32 %v1349_v31, %v647_v20  ;;  %v648_v28 = vadd.f32 %v640_v19, %v632_v21  ;;  %v547_v29 = vpop.f32.mrb[13].mxu1 }
 0x293   :  { %v724_v30 = vpack.c.bf16 %v716_v22, %v716_v22  ;;  %v676_v32 = vrot.slane %v675_v23, 1  ;;  %v681_v34 = vmax.f32 %v679_v18, %v680_v24  ;;  %v549_v35 = vpop.f32.mrb[14].mxu1  ;;  %v625_v40 = vrot.slane %v547_v29, 1 }
 0x294   :  { %v684_v37 = vrot.slane %v656_v27, 4  ;;  %v657_v38 = vadd.f32 %v1349_v31, %v648_v28  ;;  %v551_v41 = vpop.f32.mrb[15].mxu1  ;;  %v762_v46 = vunpack.c.l.b16 %v723_v26 }
 0x295   :  { %v763_v42 = vunpack.c.l.b16 %v724_v30  ;;  %v677_v43 = vmax.f32 %v675_v23, %v676_v32  ;;  %v682_v44 = vrot.slane %v681_v34, 1  ;;  %v626_v45 = vrot.slane %v551_v41, 1 }
 0x296   :  { %v685_v48 = vmax.f32 %v656_v27, %v684_v37  ;;  %v690_v49 = vrot.slane %v657_v38, 4  ;;  %v633_v50 = vadd.f32 %v625_v40, %v545_v25 }
 0x297   :  { %v770_v51 = vrot.slane %v763_v42, 7  ;;  %v717_v39 = vadd.f32 %v1362_v5, %v677_v43  ;;  %v683_v52 = vmax.f32 %v681_v34, %v682_v44  ;;  %v634_v53 = vadd.f32 %v626_v45, %v549_v35 }
 0x298   :  { %v686_v54 = vrot.slane %v685_v48, 2  ;;  %v691_v47 = vmax.f32 %v657_v38, %v690_v49  ;;  %v649_v55 = vadd.f32 %v641_v33, %v633_v50 }
 0x299   :  { %v772_v56 = vsel %vm771_vm13, %v770_v51, %v762_v46  ;;  %v725_v57 = vpack.c.bf16 %v717_v39, %v717_v39  ;;  %v718_v58 = vadd.f32 %v1362_v5, %v683_v52  ;;  %v650_v59 = vadd.f32 %v642_v36, %v634_v53 }
 0x29a   :  { %v687_v60 = vmax.f32 %v685_v48, %v686_v54  ;;  %v692_v61 = vrot.slane %v691_v47, 2  ;;  %v658_v62 = vadd.f32 %v1349_v31, %v649_v55  ;;  %v936_v48 = vld [vmem:[%s1400_s6] ss:$0 sm:$0xff] }
 0x29b   :  { %v764_v63 = vunpack.c.l.b16 %v725_v57  ;;  %v726_v0 = vpack.c.bf16 %v718_v58, %v718_v58  ;;  %v659_v1 = vadd.f32 %v1349_v31, %v650_v59 }
 0x29c   :  { %v688_v2 = vrot.slane %v687_v60, 1  ;;  %v693_v3 = vmax.f32 %v691_v47, %v692_v61  ;;  %v696_v4 = vrot.slane %v658_v62, 4 }
 0x29d   :  { %v773_v6 = vrot.slane %v764_v63, 6  ;;  %v765_v7 = vunpack.c.l.b16 %v726_v0  ;;  %v702_v8 = vrot.slane %v659_v1, 4 }
 0x29e   :  { %v689_v9 = vmax.f32 %v687_v60, %v688_v2  ;;  %v694_v10 = vrot.slane %v693_v3, 1  ;;  %v697_v11 = vmax.f32 %v658_v62, %v696_v4 }
 0x29f   :  { %v775_v12 = vsel %vm774_vm14, %v773_v6, %v772_v56  ;;  %v776_v13 = vrot.slane %v765_v7, 5  ;;  %v703_v14 = vmax.f32 %v659_v1, %v702_v8 }
 0x2a0   :  { %v719_v15 = vadd.f32 %v1362_v5, %v689_v9  ;;  %v695_v16 = vmax.f32 %v693_v3, %v694_v10  ;;  %v698_v17 = vrot.slane %v697_v11, 2 }
 0x2a1   :  { %v778_v18 = vsel %vm777_vm15, %v776_v13, %v775_v12  ;;  %v704_v31 = vrot.slane %v703_v14, 2 }
 0x2a2   :  { %v727_v19 = vpack.c.bf16 %v719_v15, %v719_v15  ;;  %v720_v20 = vadd.f32 %v1362_v5, %v695_v16  ;;  %v699_v21 = vmax.f32 %v697_v11, %v698_v17 }
 0x2a3   :  { %v705_v22 = vmax.f32 %v703_v14, %v704_v31 }
 0x2a4   :  { %v766_v23 = vunpack.c.l.b16 %v727_v19  ;;  %v728_v24 = vpack.c.bf16 %v720_v20, %v720_v20  ;;  %v700_v25 = vrot.slane %v699_v21, 1 }
 0x2a5   :  { %v706_v26 = vrot.slane %v705_v22, 1 }
 0x2a6   :  { %v779_v27 = vrot.slane %v766_v23, 4  ;;  %v767_v28 = vunpack.c.l.b16 %v728_v24  ;;  %v701_v29 = vmax.f32 %v699_v21, %v700_v25 }
 0x2a7   :  { %v707_v30 = vmax.f32 %v705_v22, %v706_v26 }
 0x2a8   :  { %v782_v32 = vrot.slane %v767_v28, 3  ;;  %v721_v33 = vadd.f32 %v1362_v5, %v701_v29  ;;  %v781_v34 = vsel %vm780_vm0, %v779_v27, %v778_v18 }
 0x2a9   :  { %v722_v35 = vadd.f32 %v1362_v5, %v707_v30 }
 0x2aa   :  { %v729_v36 = vpack.c.bf16 %v721_v33, %v721_v33  ;;  %v784_v37 = vsel %vm783_vm1, %v782_v32, %v781_v34 }
 0x2ab   :  { %v730_v38 = vpack.c.bf16 %v722_v35, %v722_v35 }
 0x2ac   :  { %v768_v40 = vunpack.c.l.b16 %v729_v36 }
 0x2ad   :  { %v769_v41 = vunpack.c.l.b16 %v730_v38 }
 0x2ae   :  { %v785_v42 = vrot.slane %v768_v40, 2 }
 0x2af   :  { %v788_v43 = vrot.slane %v769_v41, 1 }
 0x2b0   :  { %v787_v44 = vsel %vm786_vm2, %v785_v42, %v784_v37 }
 0x2b1   :  { %v790_v45 = vsel %vm789_vm3, %v788_v43, %v787_v44 }
 0x2b2   :  { %v791_v46 = vpack.c.b16 %v790_v45, %v790_v45 }
 0x2b4   :  { %1055 = vmatmul.mubr.bf16.vlgmr.msra.gmra.mrb[16].mxu1 %v791_v46 }
 0x387   :  { %v875_v5 = vpop.f32.mrb[16].mxu1 }
 0x388   :  { %v876_v49 = vadd.f32 %v936_v48, %v875_v5  ;;  %v1056_v50 = vpop.f32.mrb[17].mxu1 }
 0x389   :  { %v878_v51 = vpop.f32.mrb[18].mxu1 }
 0x38a   :  { %881 = vst [vmem:[#allocation10] sm:$0xff] %v876_v49  ;;  %v1057_v39 = vpop.f32.mrb[19].mxu1 }
 0x38b   :  { %1218 = shalt.err (!%p1215_p8)
}
 0x38c   :  { %s1219_s6 = scalar_lea.hbm %s1401_s7, 128 }
 0x38d   :  { %p1220_p9 = scmp.ne.s32.totalorder %s1401_s7, %s1219_s6  ;;  %p1223_p10 = scmp.lt.u32.totalorder %s1219_s6, %s1401_s7 }
 0x38f   :  { %p1225_p11 = pnand %p1223_p10, %p1220_p9 }
 0x391   :  { %1228 = shalt.err (!%p1225_p11)
}
 0x392   :  { %891 = dma.vmem_to_hbm [thread:$0]  %s889_s30, 128, %s1401_s7, [#allocation4]  }
 0x393   :  { %1235 = dma.done.wait [#allocation4], 128  }
 0x394   :  { %1236 = vsyncadd [#allocation4], 4294967168 }
 0x395   :  { %895 = vsyncpa [#allocation3], 1 }
 0x396   :  { %896 = vsyncpa [#allocation6], 1 }
 0x397   :  { %897 = vsyncpa [#allocation9], 1 }
 0x398   :  { %898 = vsyncpa [#allocation4], 1 }

</bundles_post_ra>
